<compile_context>
chip_gen: v7x
topology: tpu7x:2x2x1
jax: 0.10.0
libtpu: 0.0.40
codegen_flags: <defaults>
</compile_context>

<pallas_src>
import math
import functools

import jax
import jax.numpy as jnp
from jax.experimental import pallas as pl
from jax.experimental.pallas import tpu as pltpu

F32 = jnp.float32
BF16 = jnp.bfloat16


# ----------------------------- Pallas kernels ------------------------------

def _encoder_kernel(emb_ref, bias_ref, emb_g_ref, emb_b_ref,
                    wqkv_ref, bqkv_ref, wo_ref, bo_ref,
                    ln1_g_ref, ln1_b_ref, w1_ref, b1_ref,
                    w2_ref, b2_ref, ln2_g_ref, ln2_b_ref,
                    x_out_ref, ctx_scratch,
                    *, num_layers, num_heads, batch, seq, eps):
    """Whole BERT encoder fused into one kernel (all intermediates in VMEM)."""
    H = emb_ref.shape[-1]
    Dh = H // num_heads
    scale = 1.0 / math.sqrt(Dh)

    def ln(v, g, b):
        mu = jnp.mean(v, axis=-1, keepdims=True)
        var = jnp.mean(jnp.square(v - mu), axis=-1, keepdims=True)
        return (v - mu) * jax.lax.rsqrt(var + eps) * g + b

    def mm(a, w):
        # bf16 operands (native MXU dtype on v6e/v7x), f32 accumulation.
        return jnp.dot(a.astype(BF16), w.astype(BF16),
                       preferred_element_type=jnp.float32)

    # Embedding LayerNorm (no dummy zero-residual tensor).
    x = ln(emb_ref[...], emb_g_ref[...], emb_b_ref[...])          # (B*S, H) f32

    for l in range(num_layers):                                   # static unroll
        # ---- fused Q|K|V projection: one (B*S,H) x (H,3H) MXU matmul ----
        qkv = mm(x, wqkv_ref[l]) + bqkv_ref[l:l + 1, :]
        q = qkv[:, 0:H]
        k = qkv[:, H:2 * H]
        v = qkv[:, 2 * H:3 * H]

        # ---- attention: heads are lane slices, context written lane-dense ----
        for b in range(batch):
            r0 = b * seq
            bias_b = bias_ref[b:b + 1, :]                          # (1, S)
            for h in range(num_heads):
                c0 = h * Dh
                qh = q[r0:r0 + seq, c0:c0 + Dh]                    # (S, Dh)
                kh = k[r0:r0 + seq, c0:c0 + Dh]
                vh = v[r0:r0 + seq, c0:c0 + Dh]
                s = jax.lax.dot_general(qh, kh, (((1,), (1,)), ((), ())),
                                        preferred_element_type=jnp.float32)
                s = s * scale + bias_b
                s = s - jnp.max(s, axis=-1, keepdims=True)
                p = jnp.exp(s)
                p = p * pl.reciprocal(jnp.sum(p, axis=-1, keepdims=True),
                                      approx=True)                 # EUP slot
                ctx_scratch[r0:r0 + seq, c0:c0 + Dh] = jnp.dot(
                    p, vh, preferred_element_type=jnp.float32)

        # ---- output projection + residual + LN1 ----
        attn = mm(ctx_scratch[...], wo_ref[l]) + bo_ref[l:l + 1, :]
        x = ln(attn + x, ln1_g_ref[l:l + 1, :], ln1_b_ref[l:l + 1, :])

        # ---- FFN (gelu) + residual + LN2, intermediate never leaves VMEM ----
        # TODO(synk): HF BERT uses erf-gelu; tanh-approx used for a guaranteed
        # Mosaic lowering (numerically very close).
        hmid = jax.nn.gelu(mm(x, w1_ref[l]) + b1_ref[l:l + 1, :],
                           approximate=True)
        ffn = mm(hmid, w2_ref[l]) + b2_ref[l:l + 1, :]
        x = ln(ffn + x, ln2_g_ref[l:l + 1, :], ln2_b_ref[l:l + 1, :])

    x_out_ref[...] = x


def _linear_kernel(x_ref, w_ref, b_ref, o_ref, *, pre_tanh):
    x = x_ref[...]
    if pre_tanh:                       # Discriminator: tanh -> dropout(0) -> fc
        x = jnp.tanh(x)
    o_ref[...] = (jnp.dot(x, w_ref[...], preferred_element_type=jnp.float32)
                  + b_ref[...])


def linear(x, w, b, *, pre_tanh=False):
    M, K = x.shape
    Kw, N = w.shape
    assert K == Kw
    vspec = pl.BlockSpec(memory_space=pltpu.MemorySpace.VMEM)
    return pl.pallas_call(
        functools.partial(_linear_kernel, pre_tanh=pre_tanh),
        out_shape=jax.ShapeDtypeStruct((M, N), F32),
        in_specs=[vspec] * 3,
        out_specs=vspec,
    )(x.astype(F32), w.astype(F32), b.reshape(1, N).astype(F32))


# ------------------------------ configuration ------------------------------

class CFG:
    num_labels = 3              # real classes; discriminator outputs num_labels+1
    fake_labels = [0, 1, 2, 3]  # generator's fake label values
    dropout = 0.0               # nn.Dropout -> identity (deterministic)
    max_len = 16                # sequence length == Generator input_dim
    # small stand-ins for the pretrained BERT config (module hardcodes 768):
    hidden = 128
    num_heads = 4
    num_layers = 2
    intermediate = 512
    vocab_size = 100
    type_vocab_size = 2


# ------------------------------- parameters --------------------------------

def init_params(key, cfg):
    H, I = cfg.hidden, cfg.intermediate

    def nrm(k, shape):
        return 0.02 * jax.random.normal(k, shape, F32)

    keys = iter(jax.random.split(key, 64))
    p = {
        "word_emb": nrm(next(keys), (cfg.vocab_size, H)),
        "pos_emb": nrm(next(keys), (cfg.max_len, H)),
        "type_emb": nrm(next(keys), (cfg.type_vocab_size, H)),
        "emb_ln_g": jnp.ones((H,), F32),
        "emb_ln_b": jnp.zeros((H,), F32),
        "layers": [],
        # Generator: nn.Linear(max_len, hidden)
        "gen_w": nrm(next(keys), (cfg.max_len, H)),
        "gen_b": jnp.zeros((H,), F32),
        # Discriminator: nn.Linear(hidden, num_labels + 1)
        "disc_w": nrm(next(keys), (H, cfg.num_labels + 1)),
        "disc_b": jnp.zeros((cfg.num_labels + 1,), F32),
    }
    for _ in range(cfg.num_layers):
        p["layers"].append({
            "wq": nrm(next(keys), (H, H)), "bq": jnp.zeros((H,), F32),
            "wk": nrm(next(keys), (H, H)), "bk": jnp.zeros((H,), F32),
            "wv": nrm(next(keys), (H, H)), "bv": jnp.zeros((H,), F32),
            "wo": nrm(next(keys), (H, H)), "bo": jnp.zeros((H,), F32),
            "ln1_g": jnp.ones((H,), F32), "ln1_b": jnp.zeros((H,), F32),
            "w1": nrm(next(keys), (H, I)), "b1": jnp.zeros((I,), F32),
            "w2": nrm(next(keys), (I, H)), "b2": jnp.zeros((H,), F32),
            "ln2_g": jnp.ones((H,), F32), "ln2_b": jnp.zeros((H,), F32),
        })
    return p


# ------------------------------ model pieces -------------------------------

def bert_backbone(params, cfg, input_ids, attention_mask, token_type_ids):
    """BertBase.forward: returns last_hidden_state[:, 0, :]  (CLS vector)."""
    B, S = input_ids.shape
    H, L = cfg.hidden, cfg.num_layers

    # Embedding gathers are glue (no Pallas gather needed at this size).
    emb = (jnp.take(params["word_emb"], input_ids, axis=0)
           + params["pos_emb"][None, :, :]
           + jnp.take(params["type_emb"], token_type_ids, axis=0))
    emb = emb.reshape(B * S, H).astype(F32)

    # HF-BERT extended attention mask: (1 - mask) * -10000, same for all queries.
    mask_bias = (1.0 - attention_mask.astype(F32)) * -10000.0       # (B, S)

    layers = params["layers"]
    wqkv = jnp.stack([jnp.concatenate([lp["wq"], lp["wk"], lp["wv"]], axis=1)
                      for lp in layers])                            # (L, H, 3H)
    bqkv = jnp.stack([jnp.concatenate([lp["bq"], lp["bk"], lp["bv"]])
                      for lp in layers])                            # (L, 3H)
    wo = jnp.stack([lp["wo"] for lp in layers])                     # (L, H, H)
    bo = jnp.stack([lp["bo"] for lp in layers])                     # (L, H)
    ln1_g = jnp.stack([lp["ln1_g"] for lp in layers])
    ln1_b = jnp.stack([lp["ln1_b"] for lp in layers])
    w1 = jnp.stack([lp["w1"] for lp in layers])                     # (L, H, I)
    b1 = jnp.stack([lp["b1"] for lp in layers])                     # (L, I)
    w2 = jnp.stack([lp["w2"] for lp in layers])                     # (L, I, H)
    b2 = jnp.stack([lp["b2"] for lp in layers])                     # (L, H)
    ln2_g = jnp.stack([lp["ln2_g"] for lp in layers])
    ln2_b = jnp.stack([lp["ln2_b"] for lp in layers])

    kern = functools.partial(_encoder_kernel, num_layers=L,
                             num_heads=cfg.num_heads, batch=B, seq=S, eps=1e-12)
    vspec = pl.BlockSpec(memory_space=pltpu.MemorySpace.VMEM)
    x = pl.pallas_call(
        kern,
        out_shape=jax.ShapeDtypeStruct((B * S, H), F32),
        in_specs=[vspec] * 16,
        out_specs=vspec,
        scratch_shapes=[pltpu.VMEM((B * S, H), F32)],
    )(emb, mask_bias,
      params["emb_ln_g"].reshape(1, H), params["emb_ln_b"].reshape(1, H),
      wqkv, bqkv, wo, bo, ln1_g, ln1_b, w1, b1, w2, b2, ln2_g, ln2_b)

    return x.reshape(B, S, H)[:, 0, :]


def generator_forward(params, cfg, rng):
    """Generator.forward: shuffled fake labels -> noisy inputs -> fc."""
    fake_labels = jnp.asarray(cfg.fake_labels, dtype=jnp.int32)
    n = fake_labels.shape[0]
    k_perm, k_noise = jax.random.split(rng)
    shuffled = fake_labels[jax.random.permutation(k_perm, n)]   # random.shuffle
    noise = 0.5 * jax.random.normal(k_noise, (n, cfg.max_len), F32)
    inputs = shuffled[:, None].astype(F32) * jnp.ones((n, cfg.max_len), F32) + noise
    embeddings = linear(inputs, params["gen_w"], params["gen_b"])
    return embeddings, shuffled


def discriminator_forward(params, batch):
    # tanh -> dropout(p=0, identity) -> fc, fused into one Pallas kernel.
    return linear(batch, params["disc_w"], params["disc_b"], pre_tanh=True)


def ganbert_forward(params, cfg, input_ids=None, token_type_ids=None,
                    attention_mask=None, labels=None, *, training=True,
                    fix_generator=True, rng=None):
    num_labels_total = cfg.num_labels + 1
    num_fake = len(cfg.fake_labels)
    if training:
        fake_sample, fake_labels = generator_forward(params, cfg, rng)
        if fix_generator:
            fake_labels = (num_labels_total - 1) * jnp.ones((num_fake,), jnp.int32)
            real_sample = bert_backbone(params, cfg, input_ids,
                                        attention_mask, token_type_ids)
            samples = jnp.concatenate([fake_sample, real_sample], axis=0)
            out_labels = jnp.concatenate([fake_labels, labels.astype(jnp.int32)],
                                         axis=0)
            logits = discriminator_forward(params, samples)
            return logits, out_labels
        else:
            logits = discriminator_forward(params, fake_sample)
            return logits, fake_labels
    else:
        real_sample = bert_backbone(params, cfg, input_ids,
                                    attention_mask, token_type_ids)
        return discriminator_forward(params, real_sample)


# ---------------------------------- main ------------------------------------

if __name__ == "__main__":
    cfg = CFG()
    key = jax.random.PRNGKey(0)
    kp, ki, kl, kg = jax.random.split(key, 4)
    params = init_params(kp, cfg)

    B, S = 2, cfg.max_len
    input_ids = jax.random.randint(ki, (B, S), 0, cfg.vocab_size, dtype=jnp.int32)
    token_type_ids = jnp.zeros((B, S), jnp.int32)
    attention_mask = jnp.concatenate(
        [jnp.ones((B, S - 4), jnp.int32), jnp.zeros((B, 4), jnp.int32)], axis=1)
    labels = jax.random.randint(kl, (B,), 0, cfg.num_labels, dtype=jnp.int32)

    logits, out_labels = ganbert_forward(
        params, cfg, input_ids=input_ids, token_type_ids=token_type_ids,
        attention_mask=attention_mask, labels=labels,
        training=True, fix_generator=True, rng=kg)
    jax.block_until_ready((logits, out_labels))

    n_fake = len(cfg.fake_labels)
    assert logits.shape == (n_fake + B, cfg.num_labels + 1)
    assert logits.dtype == jnp.float32
    assert out_labels.shape == (n_fake + B,)
    assert bool(jnp.all(jnp.isfinite(logits)))

    # also exercise the eval branch
    eval_logits = ganbert_forward(
        params, cfg, input_ids=input_ids, token_type_ids=token_type_ids,
        attention_mask=attention_mask, training=False)
    jax.block_until_ready(eval_logits)
    assert eval_logits.shape == (B, cfg.num_labels + 1)

    print("KERNEL_OK")
</pallas_src>

<mosaic_0001>
module attributes {stable_mosaic.version = 11 : i64} {
  func.func @_linear_kernel(%arg0: memref<4x16xf32, #tpu.memory_space<vmem>>, %arg1: memref<16x128xf32, #tpu.memory_space<vmem>>, %arg2: memref<1x128xf32, #tpu.memory_space<vmem>>, %arg3: memref<4x128xf32, #tpu.memory_space<vmem>>) attributes {dimension_semantics = [], scalar_prefetch = 0 : i64, scratch_operands = 0 : i64, tpu.core_type = #tpu.core_type<tc>} {
    %c0 = arith.constant 0 : index
    %c0_0 = arith.constant 0 : index
    %0 = vector.load %arg0[%c0, %c0_0] : memref<4x16xf32, #tpu.memory_space<vmem>>, vector<4x16xf32>
    %c0_1 = arith.constant 0 : index
    %c0_2 = arith.constant 0 : index
    %1 = vector.load %arg1[%c0_1, %c0_2] : memref<16x128xf32, #tpu.memory_space<vmem>>, vector<16x128xf32>
    %cst = arith.constant dense<0.000000e+00> : vector<4x128xf32>
    %2 = tpu.matmul %0, %1, %cst {dimension_numbers = #tpu.dot_dimension_numbers<[1], [0], [0], [1], [0, 0, 1, 1], [], []>} : vector<4x16xf32>, vector<16x128xf32>, vector<4x128xf32> -> vector<4x128xf32>
    %c0_3 = arith.constant 0 : index
    %c0_4 = arith.constant 0 : index
    %3 = vector.load %arg2[%c0_3, %c0_4] : memref<1x128xf32, #tpu.memory_space<vmem>>, vector<1x128xf32>
    %4 = vector.broadcast %3 : vector<1x128xf32> to vector<4x128xf32>
    %5 = arith.addf %2, %4 : vector<4x128xf32>
    %c0_5 = arith.constant 0 : index
    %c0_6 = arith.constant 0 : index
    %6 = vector.load %arg3[%c0_5, %c0_6] : memref<4x128xf32, #tpu.memory_space<vmem>>, vector<4x128xf32>
    tpu.vector_store %arg3[%c0_5, %c0_6], %5 {strides = array<i32>} : memref<4x128xf32, #tpu.memory_space<vmem>>, vector<4x128xf32>,
    return
  }
}

</mosaic_0001>

<bundles_post_ra>
// kernel: tpu_custom_call.1
= control target key start
LH: loop header
LB: loop body
LE: loop exit
PB: predicated region body
PF: predicated region fallthrough
CT: control target
= control target key end

     0   :  { %8 = vsyncpa [#allocation3], 0  ;;  %s311_s0 = inlined_call_operand.hbm [shape: f32[4,16], index: 0, kind: input, shape index: {}]   ;;  %s312_s1 = inlined_call_operand.hbm [shape: f32[16,128], index: 1, kind: input, shape index: {}]   ;;  %s313_s2 = inlined_call_operand.vmem [shape: f32[1,128], index: 2, kind: input, shape index: {}]   ;;  %s314_s3 = inlined_call_operand.hbm [shape: f32[4,128], index: 3, kind: output, shape index: {}]  }
   0x1   :  { %9 = vsyncpa [#allocation6], 0 }
   0x2   :  { %10 = vsyncpa [#allocation4], 0  ;;  %s237_s12 = smov [#allocation2]   ;;  %s238_s14 = smov [#allocation5]  }
   0x3   :  { %s17_s13 = sshll.u32 %s237_s12, 4  ;;  %s26_s15 = sshll.u32 %s238_s14, 4  ;;  %s18_s13 = int_to_ptr.vmem [resolvable:$true] %s17_s13  ;;  %s265_s15 = int_to_ptr.vmem [resolvable:$true] %s26_s15 }
   0x4   :  { %s165_s18 = scalar_lea.hbm %s311_s0, 64 }
   0x5   :  { %p166_p0 = scmp.ne.s32.totalorder %s311_s0, %s165_s18  ;;  %p169_p1 = scmp.lt.u32.totalorder %s165_s18, %s311_s0 }
   0x7   :  { %p171_p2 = pnand %p169_p1, %p166_p0 }
   0x9   :  { %174 = shalt.err (!%p171_p2)
}
   0xa   :  { %s175_s23 = scalar_lea.vmem %s18_s13, 64  ;;  %p180_p4 = scmp.lt.s32.totalorder %s18_s13, %s18_s13 }
   0xb   :  { %p176_p3 = scmp.ne.s32.totalorder %s18_s13, %s175_s23  ;;  %p181_p5 = scmp.lt.s32.totalorder %s175_s23, %s175_s23 }
   0xd   :  { %p182_p6 = por %p181_p5, %p180_p4 }
   0xf   :  { %p183_p7 = pnand %p182_p6, %p176_p3 }
  0x11   :  { %186 = shalt.err (!%p183_p7)
}
  0x12   :  { %20 = dma.hbm_to_vmem [thread:$0]  %s311_s0, 64, %s18_s13, [#allocation3]  }
  0x13   :  { %s187_s28 = scalar_lea.hbm %s312_s1, 256 }
  0x14   :  { %p188_p8 = scmp.ne.s32.totalorder %s312_s1, %s187_s28  ;;  %p191_p9 = scmp.lt.u32.totalorder %s187_s28, %s312_s1 }
  0x16   :  { %p193_p10 = pnand %p191_p9, %p188_p8 }
  0x18   :  { %196 = shalt.err (!%p193_p10)
}
  0x19   :  { %s197_s6 = scalar_lea.vmem %s265_s15, 256  ;;  %p202_p12 = scmp.lt.s32.totalorder %s265_s15, %s265_s15 }
  0x1a   :  { %p198_p11 = scmp.ne.s32.totalorder %s265_s15, %s197_s6  ;;  %p203_p13 = scmp.lt.s32.totalorder %s197_s6, %s197_s6 }
  0x1c   :  { %p204_p0 = por %p203_p13, %p202_p12 }
  0x1e   :  { %p205_p1 = pnand %p204_p0, %p198_p11 }
  0x20   :  { %208 = shalt.err (!%p205_p1)
}
  0x21   :  { %s239_s0 = smov 128   ;;  %s240_s7 = smov 8  }
  0x22   :  { %32 = dma.hbm_to_vmem [thread:$0]  %s312_s1, 256, %s265_s15, [#allocation6], %s239_s0, %s239_s0, %s240_s7  }
  0x23   :  { %231 = dma.done.wait [#allocation3], 64  }
  0x24   :  { %232 = vsyncadd [#allocation3], 4294967232 }
  0x25   :  { %233 = dma.done.wait [#allocation6], 256  }
  0x26   :  { %234 = vsyncadd [#allocation6], 4294967040  ;;  %v241_v0 = vmov 0.0|0.0   ;;  %vm242_vm0 = vmmov 0   ;;  %v243_v1 = vmov 0.0   ;;  %v42_v2 = vld [vmem:[#allocation5] sm:$0xff] }
  0x27   :  { %154 = vmatprep.subr.bf16.mxu0 %v241_v0  ;;  %151 = vmatprep.mubr.msk.f32.mxu0 %vm242_vm0, %v243_v1  ;;  %v43_v3 = vld [vmem:[#allocation5 + $0x8] sm:$0xff]  ;;  %v41_v5 = vld [vmem:[#allocation2] sm:$0xf]  ;;  %vm51_vm1 = vcmask 130048   ;;  %s244_s1 = smov [#allocation7]  }
  0x28   :  { %v155_v4 = vpack.c.bf16 %v43_v3, %v42_v2  ;;  %v142_v6 = vld [vmem:[%s313_s2] ss:$0 sm:$0xff]  ;;  %s132_s12 = sshll.u32 %s244_s1, 4  ;;  %s133_s12 = int_to_ptr.vmem [resolvable:$true] %s132_s12 }
  0x29   :  { %s209_s13 = scalar_lea.vmem %s133_s12, 64  ;;  %p214_p3 = scmp.lt.s32.totalorder %s133_s12, %s133_s12 }
  0x2a   :  { %156 = vmatpush3.bf16.msra.mxu0 %v155_v4  ;;  %p210_p2 = scmp.ne.s32.totalorder %s133_s12, %s209_s13  ;;  %p215_p4 = scmp.lt.s32.totalorder %s209_s13, %s209_s13 }
  0x2c   :  { %p216_p5 = por %p215_p4, %p214_p3 }
  0x2d   :  { %152 = vmatmul.mubr.msk.f32.vlgmr.msra.gmra.mrb[0].mxu0 %vm51_vm1, %v41_v5 }
  0x2e   :  { %p217_p6 = pnand %p216_p5, %p210_p2 }
 0x100   :  { %v121_v7 = vpop.f32.mrb[0].mxu0 }
 0x101   :  { %v122_v8 = vadd.f32 %v142_v6, %v121_v7  ;;  %v153_v9 = vpop.f32.mrb[1].mxu0 }
 0x103   :  { %125 = vst [vmem:[#allocation7] sm:$0xf] %v122_v8 }
 0x104   :  { %220 = shalt.err (!%p217_p6)
}
 0x105   :  { %s221_s16 = scalar_lea.hbm %s314_s3, 64 }
 0x106   :  { %p222_p7 = scmp.ne.s32.totalorder %s314_s3, %s221_s16  ;;  %p225_p8 = scmp.lt.u32.totalorder %s221_s16, %s314_s3 }
 0x108   :  { %p227_p9 = pnand %p225_p8, %p222_p7 }
 0x10a   :  { %230 = shalt.err (!%p227_p9)
}
 0x10b   :  { %135 = dma.vmem_to_hbm [thread:$0]  %s133_s12, 64, %s314_s3, [#allocation4]  }
 0x10c   :  { %235 = dma.done.wait [#allocation4], 64  }
 0x10d   :  { %236 = vsyncadd [#allocation4], 4294967232 }
 0x10e   :  { %139 = vsyncpa [#allocation3], 1 }
 0x10f   :  { %140 = vsyncpa [#allocation6], 1 }
 0x110   :  { %141 = vsyncpa [#allocation4], 1 }

</bundles_post_ra>
